<compile_context>
chip_gen: v5e
topology: v5e:2x2
jax: 0.10.0
libtpu: 0.0.40
codegen_flags: <defaults>
</compile_context>

<pallas_src>
import functools

import jax
import jax.numpy as jnp
from jax.experimental import pallas as pl
from jax.experimental.pallas import tpu as pltpu


# ---------------------------------------------------------------------------
# Helpers
# ---------------------------------------------------------------------------
def _round_up(x: int, m: int) -> int:
    return ((x + m - 1) // m) * m


def _sublane(dtype) -> int:
    itemsize = jnp.dtype(dtype).itemsize
    return {4: 8, 2: 16, 1: 32}.get(itemsize, 8)


def _tpu_info():
    """(vmem_capacity_bytes, lowercase device_kind) with safe fallbacks."""
    kind = ""
    try:
        kind = jax.devices()[0].device_kind.lower()
    except Exception:
        pass
    vmem_cap = None
    try:
        vmem_cap = int(pltpu.get_tpu_info().vmem_capacity_bytes)
    except Exception:
        vmem_cap = None
    if not vmem_cap:
        # v7x has 64 MiB/TC; v5e/v6e have 128 MiB.
        vmem_cap = (64 if "v7" in kind else 128) * 1024 * 1024
    return vmem_cap, kind


# ---------------------------------------------------------------------------
# Kernel
# ---------------------------------------------------------------------------
def _mlp_kernel(x_ref, wgu_ref, wd_ref, o_ref, acc_ref, *, ti):
    """One (token-tile i, H-tile h, I-tile k) step of the fused MLP.

    x_ref  : [tm, H]      activations (native dtype, reused across h/k)
    wgu_ref: [H, 2*ti]    merged [gate | up] projection slice (one stream)
    wd_ref : [ti, th]     down projection slice
    o_ref  : [tm, th]     output tile (written on last k step)
    acc_ref: [tm, th]     fp32 VMEM accumulator (persists across the k axis)
    """
    k = pl.program_id(2)

    x = x_ref[...]  # native dtype -> full-rate MXU, fp32 accumulate

    # One MXU launch for gate+up (merged weight stream), split lane-aligned.
    gu = jnp.dot(x, wgu_ref[...], preferred_element_type=jnp.float32)  # [tm, 2*ti]
    gate = gu[:, :ti]
    up = gu[:, ti:]

    # SiluAndMul: silu(gate) * up  (sigmoid lowers to the EUP, not a VALU divide)
    act = gate * jax.nn.sigmoid(gate) * up                             # [tm, ti] f32

    # Partial down-projection for this I-slice, fp32 accumulation.
    part = jnp.dot(act.astype(wd_ref.dtype), wd_ref[...],
                   preferred_element_type=jnp.float32)                 # [tm, th]

    @pl.when(k == 0)
    def _():
        acc_ref[...] = part            # direct store: no zero-init round trip

    @pl.when(k != 0)
    def _():
        acc_ref[...] += part

    @pl.when(k == pl.num_programs(2) - 1)
    def _():
        o_ref[...] = acc_ref[...].astype(o_ref.dtype)


# ---------------------------------------------------------------------------
# Load-time weight repack (NOT in the per-call hot path)
# ---------------------------------------------------------------------------
def prepare_mlp_weights(gate_up_weight, down_weight, *, ti=512):
    """One-time weight repack.

    gate_up_weight: [2*I, H]  (PyTorch MergedColumnParallelLinear layout)
    down_weight   : [H, I]    (PyTorch RowParallelLinear layout)

    Returns (wgu, wd, ti):
      wgu: [H, nk*2*ti]  block k (size 2*ti) = [Wg[:, k*ti:(k+1)*ti] | Wu[:, ...]]
      wd : [I_pad, H]
    I is zero-padded to a multiple of ti (exact: padded Wd rows are zero).
    """
    gate_up_weight = jnp.asarray(gate_up_weight)
    down_weight = jnp.asarray(down_weight)
    two_i, H = gate_up_weight.shape
    I = two_i // 2
    assert down_weight.shape == (H, I)

    # ti: multiple of 128, <= requested, and not larger than needed.
    ti = max(128, min(_round_up(ti, 128), _round_up(I, 128)))
    I_pad = _round_up(I, ti)
    nk = I_pad // ti

    wg = gate_up_weight[:I, :].T          # [H, I]
    wu = gate_up_weight[I:, :].T          # [H, I]
    wd = down_weight.T                    # [I, H]
    if I_pad != I:
        pad = I_pad - I
        wg = jnp.pad(wg, ((0, 0), (0, pad)))
        wu = jnp.pad(wu, ((0, 0), (0, pad)))
        wd = jnp.pad(wd, ((0, pad), (0, 0)))

    # Interleave per ti block so the kernel index_map stays (0, k).
    wg_b = wg.reshape(H, nk, ti)
    wu_b = wu.reshape(H, nk, ti)
    wgu = jnp.concatenate([wg_b, wu_b], axis=-1).reshape(H, nk * 2 * ti)
    return wgu, wd, ti


# ---------------------------------------------------------------------------
# Wrapper
# ---------------------------------------------------------------------------
def llama_mlp(x, wgu, wd, ti, *, tm=None, nh=None, weight_buffers=None):
    """Fused LlamaMLP forward.

    x  : [T, H]
    wgu: [H, nk*2*ti], wd: [I_pad, H]  (pre-packed via prepare_mlp_weights)
    tm : token tile (default: generation-aware; auto-shrunk to fit VMEM)
    nh : H-split grid axis (default: 2 on v7x decode-like shapes, else 1)
    weight_buffers: optional pipeline depth for weight streams (e.g. 3 on v5e
                    when profiling shows exposed weight DMA).
    """
    T, H = x.shape
    I_pad, Hd = wd.shape
    assert Hd == H
    nk = I_pad // ti
    assert nk * ti == I_pad and wgu.shape == (H, nk * 2 * ti), (
        f"wgu shape {wgu.shape} inconsistent with I_pad={I_pad}, ti={ti}")

    vmem_cap, kind = _tpu_info()
    sub = _sublane(x.dtype)

    # --- generation-aware token tile (weight-streaming roofline) ------------
    if tm is None:
        if "v6" in kind:
            tm = 1024          # v6e: ~918 TF/s / ~1.4 TB/s  -> need tm >= ~768
        else:
            tm = 512           # v7x (~310 flop/B) / v5e (~240 flop/B) / unknown
    tm = max(sub, _round_up(min(tm, _round_up(T, sub)), sub))

    # --- H-split so both TensorCores work on 2-TC chips during decode -------
    if nh is None:
        decode_like = _round_up(T, tm) == tm          # single token tile
        nh = 2 if ("v7" in kind and decode_like and H % 256 == 0) else 1
    if H % nh != 0 or (nh > 1 and (H // nh) % 128 != 0):
        nh = 1
    th = H // nh

    it_x = jnp.dtype(x.dtype).itemsize
    it_w = jnp.dtype(wgu.dtype).itemsize

    def vmem_bytes(tm_):
        return (2 * (tm_ * H * it_x          # x tile (double-buffered)
                     + H * 2 * ti * it_w     # merged [gate|up] weight block
                     + ti * th * it_w        # down-proj weight block
                     + tm_ * th * it_x)      # output tile
                + tm_ * th * 4)              # fp32 accumulator scratch

    # Shrink the token tile until the working set fits this chip's VMEM.
    headroom = 6 * 1024 * 1024
    while vmem_bytes(tm) + headroom > vmem_cap and tm > sub:
        tm = max(sub, _round_up(tm // 2, sub))

    T_pad = _round_up(T, tm)
    x_p = x if T_pad == T else jnp.pad(x, ((0, T_pad - T), (0, 0)))

    grid = (T_pad // tm, nh, nk)

    est = vmem_bytes(tm)
    vmem_limit = int(max(32 * 1024 * 1024,
                         min(vmem_cap - 2 * 1024 * 1024, est + 8 * 1024 * 1024)))
    vmem_limit = min(vmem_limit, vmem_cap)   # never request beyond physical VMEM

    # --- advisory cost estimate for XLA scheduling ---------------------------
    n_token_tiles = T_pad // tm
    flops = int(T_pad * H * I_pad * (4 * nh + 2))
    transcendentals = int(T_pad * I_pad * nh)
    bytes_accessed = int(n_token_tiles * (nh * wgu.size * it_w + wd.size * it_w)
                         + x_p.size * it_x + T_pad * H * it_x)

    wspec_kwargs = {}
    if weight_buffers is not None:
        wspec_kwargs = dict(pipeline_mode=pl.Buffered(weight_buffers))

    out = pl.pallas_call(
        functools.partial(_mlp_kernel, ti=ti),
        out_shape=jax.ShapeDtypeStruct((T_pad, H), x.dtype),
        grid_spec=pltpu.PrefetchScalarGridSpec(
            num_scalar_prefetch=0,
            grid=grid,
            in_specs=[
                pl.BlockSpec((tm, H), lambda i, h, k: (i, 0)),          # x (reused)
                pl.BlockSpec((H, 2 * ti), lambda i, h, k: (0, k),
                             **wspec_kwargs),                           # [gate|up]
                pl.BlockSpec((ti, th), lambda i, h, k: (k, h),
                             **wspec_kwargs),                           # down slice
            ],
            out_specs=pl.BlockSpec((tm, th), lambda i, h, k: (i, h)),
            scratch_shapes=[pltpu.VMEM((tm, th), jnp.float32)],
        ),
        compiler_params=pltpu.CompilerParams(
            dimension_semantics=("parallel", "parallel", "arbitrary"),
            vmem_limit_bytes=vmem_limit,
        ),
        cost_estimate=pl.CostEstimate(flops=flops,
                                      transcendentals=transcendentals,
                                      bytes_accessed=bytes_accessed),
    )(x_p, wgu, wd)

    return out[:T] if T_pad != T else out


# ---------------------------------------------------------------------------
# Pure-JAX reference (matches the PyTorch LlamaMLP forward)
# ---------------------------------------------------------------------------
def _ref_llama_mlp(x, gate_up_weight, down_weight):
    gate_up = x @ gate_up_weight.T                 # [T, 2I]
    I = gate_up.shape[-1] // 2
    gate, up = gate_up[:, :I], gate_up[:, I:]
    act = jax.nn.silu(gate) * up                   # SiluAndMul
    return act @ down_weight.T                     # [T, H]


if __name__ == "__main__":
    key = jax.random.PRNGKey(0)

    # --- check 1: tiny shapes (blocks == full dims, I padded to 128) --------
    hidden_size, intermediate_size, num_tokens = 32, 64, 8
    k_x, k_gu, k_d, key = jax.random.split(key, 4)
    x = jax.random.normal(k_x, (num_tokens, hidden_size), dtype=jnp.float32)
    gate_up_w = jax.random.normal(k_gu, (2 * intermediate_size, hidden_size),
                                  dtype=jnp.float32) * 0.05
    down_w = jax.random.normal(k_d, (hidden_size, intermediate_size),
                               dtype=jnp.float32) * 0.05

    wgu, wd, ti = prepare_mlp_weights(gate_up_w, down_w)    # load-time repack
    out = jax.block_until_ready(llama_mlp(x, wgu, wd, ti))
    ref = _ref_llama_mlp(x, gate_up_w, down_w)
    assert out.shape == (num_tokens, hidden_size)
    assert jnp.allclose(out, ref, atol=3e-4, rtol=3e-4)

    # --- check 2: streamed I-reduction, token tiling/padding and H-split ----
    hidden_size, intermediate_size, num_tokens = 256, 512, 50   # T not multiple of tm
    k_x, k_gu, k_d, key = jax.random.split(key, 4)
    x = jax.random.normal(k_x, (num_tokens, hidden_size), dtype=jnp.float32)
    gate_up_w = jax.random.normal(k_gu, (2 * intermediate_size, hidden_size),
                                  dtype=jnp.float32) * 0.05
    down_w = jax.random.normal(k_d, (hidden_size, intermediate_size),
                               dtype=jnp.float32) * 0.05

    wgu, wd, ti = prepare_mlp_weights(gate_up_w, down_w, ti=128)   # nk = 4
    out = jax.block_until_ready(
        llama_mlp(x, wgu, wd, ti, tm=16, nh=2))                    # grid = (4, 2, 4)
    ref = _ref_llama_mlp(x, gate_up_w, down_w)
    assert out.shape == (num_tokens, hidden_size)
    assert jnp.allclose(out, ref, atol=3e-3, rtol=3e-3)

    print("KERNEL_OK")
</pallas_src>

<mosaic_0001>
module attributes {stable_mosaic.version = 11 : i64} {
  func.func @_mlp_kernel(%arg0: i32, %arg1: i32, %arg2: i32, %arg3: memref<8x32xf32, #tpu.memory_space<vmem>>, %arg4: memref<32x256xf32, #tpu.memory_space<vmem>>, %arg5: memref<128x32xf32, #tpu.memory_space<vmem>>, %arg6: memref<8x32xf32, #tpu.memory_space<vmem>>, %arg7: memref<8x32xf32, #tpu.memory_space<vmem>>) attributes {dimension_semantics = [#tpu.dimension_semantics<parallel>, #tpu.dimension_semantics<parallel>, #tpu.dimension_semantics<arbitrary>], iteration_bounds = array<i64: 1, 1, 1>, scalar_prefetch = 0 : i64, scratch_operands = 1 : i64, tpu.core_type = #tpu.core_type<tc>, window_params = [{transform_indices = @transform_0, window_bounds = array<i64: 8, 32>}, {transform_indices = @transform_1, window_bounds = array<i64: 32, 256>}, {transform_indices = @transform_2, window_bounds = array<i64: 128, 32>}, {transform_indices = @transform_3, window_bounds = array<i64: 8, 32>}]} {
    %c0 = arith.constant 0 : index
    %c0_0 = arith.constant 0 : index
    %0 = vector.load %arg3[%c0, %c0_0] : memref<8x32xf32, #tpu.memory_space<vmem>>, vector<8x32xf32>
    %c0_1 = arith.constant 0 : index
    %c0_2 = arith.constant 0 : index
    %1 = vector.load %arg4[%c0_1, %c0_2] : memref<32x256xf32, #tpu.memory_space<vmem>>, vector<32x256xf32>
    %cst = arith.constant dense<0.000000e+00> : vector<8x256xf32>
    %2 = tpu.matmul %0, %1, %cst {dimension_numbers = #tpu.dot_dimension_numbers<[1], [0], [0], [1], [0, 0, 1, 1], [], []>} : vector<8x32xf32>, vector<32x256xf32>, vector<8x256xf32> -> vector<8x256xf32>
    %3 = vector.extract_strided_slice %2 {offsets = [0, 0], sizes = [8, 128], strides = [1, 1]} : vector<8x256xf32> to vector<8x128xf32>
    %4 = vector.extract_strided_slice %2 {offsets = [0, 128], sizes = [8, 128], strides = [1, 1]} : vector<8x256xf32> to vector<8x128xf32>
    %5 = arith.negf %3 : vector<8x128xf32>
    %6 = math.exp %5 : vector<8x128xf32>
    %cst_3 = arith.constant 1.000000e+00 : f32
    %7 = vector.broadcast %cst_3 : f32 to vector<8x128xf32>
    %8 = arith.addf %7, %6 : vector<8x128xf32>
    %9 = arith.divf %7, %8 : vector<8x128xf32>
    %10 = arith.mulf %3, %9 : vector<8x128xf32>
    %11 = arith.mulf %10, %4 : vector<8x128xf32>
    %c0_4 = arith.constant 0 : index
    %c0_5 = arith.constant 0 : index
    %12 = vector.load %arg5[%c0_4, %c0_5] : memref<128x32xf32, #tpu.memory_space<vmem>>, vector<128x32xf32>
    %cst_6 = arith.constant dense<0.000000e+00> : vector<8x32xf32>
    %13 = tpu.matmul %11, %12, %cst_6 {dimension_numbers = #tpu.dot_dimension_numbers<[1], [0], [0], [1], [0, 0, 1, 1], [], []>} : vector<8x128xf32>, vector<128x32xf32>, vector<8x32xf32> -> vector<8x32xf32>
    %c0_i32 = arith.constant 0 : i32
    %14 = arith.cmpi eq, %arg2, %c0_i32 : i32
    %15 = arith.extui %14 : i1 to i32
    %c0_i32_7 = arith.constant 0 : i32
    %16 = arith.cmpi ne, %15, %c0_i32_7 : i32
    scf.if %16 {
      %c0_12 = arith.constant 0 : index
      %c0_13 = arith.constant 0 : index
      %23 = vector.load %arg7[%c0_12, %c0_13] : memref<8x32xf32, #tpu.memory_space<vmem>>, vector<8x32xf32>
      tpu.vector_store %arg7[%c0_12, %c0_13], %13 {strides = array<i32>} : memref<8x32xf32, #tpu.memory_space<vmem>>, vector<8x32xf32>,
    } else {
    }
    %c0_i32_8 = arith.constant 0 : i32
    %17 = arith.cmpi ne, %arg2, %c0_i32_8 : i32
    %18 = arith.extui %17 : i1 to i32
    %c0_i32_9 = arith.constant 0 : i32
    %19 = arith.cmpi ne, %18, %c0_i32_9 : i32
    scf.if %19 {
      %c0_12 = arith.constant 0 : index
      %c0_13 = arith.constant 0 : index
      %23 = vector.load %arg7[%c0_12, %c0_13] : memref<8x32xf32, #tpu.memory_space<vmem>>, vector<8x32xf32>
      %24 = arith.addf %23, %13 : vector<8x32xf32>
      %c0_14 = arith.constant 0 : index
      %c0_15 = arith.constant 0 : index
      %25 = vector.load %arg7[%c0_14, %c0_15] : memref<8x32xf32, #tpu.memory_space<vmem>>, vector<8x32xf32>
      tpu.vector_store %arg7[%c0_14, %c0_15], %24 {strides = array<i32>} : memref<8x32xf32, #tpu.memory_space<vmem>>, vector<8x32xf32>,
    } else {
    }
    %c0_i32_10 = arith.constant 0 : i32
    %20 = arith.cmpi eq, %arg2, %c0_i32_10 : i32
    %21 = arith.extui %20 : i1 to i32
    %c0_i32_11 = arith.constant 0 : i32
    %22 = arith.cmpi ne, %21, %c0_i32_11 : i32
    scf.if %22 {
      %c0_12 = arith.constant 0 : index
      %c0_13 = arith.constant 0 : index
      %23 = vector.load %arg7[%c0_12, %c0_13] : memref<8x32xf32, #tpu.memory_space<vmem>>, vector<8x32xf32>
      %c0_14 = arith.constant 0 : index
      %c0_15 = arith.constant 0 : index
      %24 = vector.load %arg6[%c0_14, %c0_15] : memref<8x32xf32, #tpu.memory_space<vmem>>, vector<8x32xf32>
      tpu.vector_store %arg6[%c0_14, %c0_15], %23 {strides = array<i32>} : memref<8x32xf32, #tpu.memory_space<vmem>>, vector<8x32xf32>,
    } else {
    }
    return
  }
  func.func @transform_0(%arg0: i32, %arg1: i32, %arg2: i32) -> (i32, i32) {
    %c0_i32 = arith.constant 0 : i32
    %c0_i32_0 = arith.constant 0 : i32
    return %arg0, %c0_i32 : i32, i32
  }
  func.func @transform_1(%arg0: i32, %arg1: i32, %arg2: i32) -> (i32, i32) {
    %c0_i32 = arith.constant 0 : i32
    %c0_i32_0 = arith.constant 0 : i32
    return %c0_i32, %arg2 : i32, i32
  }
  func.func @transform_2(%arg0: i32, %arg1: i32, %arg2: i32) -> (i32, i32) {
    %c0_i32 = arith.constant 0 : i32
    return %arg2, %arg1 : i32, i32
  }
  func.func @transform_3(%arg0: i32, %arg1: i32, %arg2: i32) -> (i32, i32) {
    %c0_i32 = arith.constant 0 : i32
    return %arg0, %arg1 : i32, i32
  }
}

</mosaic_0001>

<bundles_post_ra>
// kernel: tpu_custom_call.1
= control target key start
LH: loop header
LB: loop body
LE: loop exit
PB: predicated region body
PF: predicated region fallthrough
CT: control target
= control target key end

     0   :  { %s295_s0 = inlined_call_operand.vmem [shape: f32[8,32], index: 0, kind: input, shape index: {}]   ;;  %s296_s1 = inlined_call_operand.vmem [shape: f32[32,256], index: 1, kind: input, shape index: {}]   ;;  %s297_s2 = inlined_call_operand.vmem [shape: f32[128,32], index: 2, kind: input, shape index: {}]   ;;  %s298_s3 = inlined_call_operand.hbm [shape: f32[8,32], index: 3, kind: output, shape index: {}]  }
   0x1   :  { %v22_v0 = vld [vmem:[%s296_s1 + $0x30] sm:$0xff]  ;;  %v20_v1 = vld [vmem:[%s296_s1 + $0x20] sm:$0xff]  ;;  %v23_v2 = vld [vmem:[%s296_s1 + $0x38] sm:$0xff] }
   0x2   :  { %40 = vmatpush.msra.mxu0 %v22_v0  ;;  %v18_v3 = vld [vmem:[%s296_s1 + $0x10] sm:$0xff]  ;;  %60 = vmatpush.msra.mxu1 %v23_v2  ;;  %v21_v4 = vld [vmem:[%s296_s1 + $0x28] sm:$0xff]  ;;  %v19_v5 = vld [vmem:[%s296_s1 + $0x18] sm:$0xff] }
   0x4   :  { %41 = vmatpush.msra.mxu0 %v20_v1 }
   0x5   :  { %8 = vsyncpa [#allocation4], 0  ;;  %v16_v6 = vld [vmem:[%s296_s1] sm:$0xff]  ;;  %61 = vmatpush.msra.mxu1 %v21_v4  ;;  %vm24_vm0 = vcmask 261120   ;;  %v17_v8 = vld [vmem:[%s296_s1 + $0x8] sm:$0xff]  ;;  %s149_s1 = sshll.u32 %s298_s3, 4  ;;  %s150_s1 = int_to_ptr.hbm [resolvable:$true] %s149_s1 }
   0x6   :  { %42 = vmatpush.msra.mxu0 %v18_v3  ;;  %v15_v7 = vld [vmem:[%s295_s0] sm:$0xff]  ;;  %v104_v9 = vld [vmem:[%s297_s2 + $0x78] sm:$0xff]  ;;  %v103_v10 = vld [vmem:[%s297_s2 + $0x70] sm:$0xff] }
   0x7   :  { %62 = vmatpush.msra.mxu1 %v19_v5  ;;  %105 = vmatpush.msra.mxu2 %v104_v9  ;;  %v102_v11 = vld [vmem:[%s297_s2 + $0x68] sm:$0xff]  ;;  %v101_v12 = vld [vmem:[%s297_s2 + $0x60] sm:$0xff]  ;;  %v100_v13 = vld [vmem:[%s297_s2 + $0x58] sm:$0xff] }
   0x8   :  { %43 = vmatpush.msra.mxu0 %v16_v6  ;;  %v99_v14 = vld [vmem:[%s297_s2 + $0x50] sm:$0xff]  ;;  %v98_v15 = vld [vmem:[%s297_s2 + $0x48] sm:$0xff]  ;;  %v97_v16 = vld [vmem:[%s297_s2 + $0x40] sm:$0xff] }
   0x9   :  { %158 = vmatmul.msk.f32.vlgmr.msra.gmra.mxu0 %vm24_vm0, %v15_v7  ;;  %63 = vmatpush.msra.mxu1 %v17_v8  ;;  %v96_v17 = vld [vmem:[%s297_s2 + $0x38] sm:$0xff]  ;;  %v95_v18 = vld [vmem:[%s297_s2 + $0x30] sm:$0xff]  ;;  %v94_v19 = vld [vmem:[%s297_s2 + $0x28] sm:$0xff] }
   0xa   :  { %159 = vmatmul.msk.f32.vlgmr.msra.gmra.mxu1 %vm24_vm0, %v15_v7  ;;  %106 = vmatpush.msra.mxu2 %v103_v10  ;;  %v93_v20 = vld [vmem:[%s297_s2 + $0x20] sm:$0xff]  ;;  %v92_v21 = vld [vmem:[%s297_s2 + $0x18] sm:$0xff]  ;;  %v91_v22 = vld [vmem:[%s297_s2 + $0x10] sm:$0xff] }
   0xb   :  { %v90_v23 = vld [vmem:[%s297_s2 + $0x8] sm:$0xff]  ;;  %v89_v24 = vld [vmem:[%s297_s2] sm:$0xff]  ;;  %s192_s2 = smov [#allocation3]  }
   0xc   :  { %107 = vmatpush.msra.mxu2 %v102_v11  ;;  %s147_s6 = sshll.u32 %s192_s2, 4  ;;  %s148_s6 = int_to_ptr.vmem [resolvable:$true] %s147_s6 }
   0xe   :  { %108 = vmatpush.msra.mxu2 %v101_v12 }
  0x10   :  { %109 = vmatpush.msra.mxu2 %v100_v13 }
  0x12   :  { %110 = vmatpush.msra.mxu2 %v99_v14 }
  0x14   :  { %111 = vmatpush.msra.mxu2 %v98_v15 }
  0x16   :  { %112 = vmatpush.msra.mxu2 %v97_v16 }
  0x18   :  { %113 = vmatpush.msra.mxu2 %v96_v17 }
  0x1a   :  { %114 = vmatpush.msra.mxu2 %v95_v18 }
  0x1c   :  { %115 = vmatpush.msra.mxu2 %v94_v19 }
  0x1e   :  { %116 = vmatpush.msra.mxu2 %v93_v20 }
  0x20   :  { %117 = vmatpush.msra.mxu2 %v92_v21 }
  0x22   :  { %118 = vmatpush.msra.mxu2 %v91_v22 }
  0x24   :  { %119 = vmatpush.msra.mxu2 %v90_v23 }
  0x26   :  { %120 = vmatpush.msra.mxu2 %v89_v24 }
  0x86   :  { %v45_v25 = vpop.f32.mrf.mxu0 }
  0x87   :  { %v160_v26 = vmul.f32 -1.442695, %v45_v25  ;;  %v65_v39 = vpop.f32.mrf.mxu1 }
  0x89   :  { %162 = vpow2.f32 %v160_v26 }
  0x8f   :  { %v163_v27 = vpop.eup %162 }
  0x90   :  { %v71_v28 = vadd.f32 1.0, %v163_v27 }
  0x92   :  { %164 = vrcp.f32 %v71_v28  ;;  %v83_v32 = vand.u32 2147483648, %v71_v28  ;;  %v81_v34 = vand.u32 2147483647, %v71_v28  ;;  %vm77_vm2 = vweird.f32 %v71_v28 }
  0x94   :  { %v84_v36 = vor.u32 1.1754944e-38, %v83_v32  ;;  %vm82_vm4 = vcmp.eq.f32.partialorder %v81_v34, 8.507059e+37 }
  0x98   :  { %v165_v29 = vpop.eup %164 }
  0x99   :  { %v73_v30 = vmul.f32 %v165_v29, %v71_v28  ;;  %vm78_vm1 = vweird.f32 %v165_v29 }
  0x9a   :  { %vm79_vm3 = vmor %vm77_vm2, %vm78_vm1 }
  0x9b   :  { %v74_v31 = vsub.f32 1.0, %v73_v30 }
  0x9d   :  { %v75_v33 = vmul.f32 %v165_v29, %v74_v31 }
  0x9f   :  { %v76_v35 = vadd.f32 %v165_v29, %v75_v33 }
  0xa1   :  { %v80_v37 = vsel %vm79_vm3, %v165_v29, %v76_v35 }
  0xa2   :  { %v85_v38 = vsel %vm82_vm4, %v84_v36, %v80_v37 }
  0xa3   :  { %v87_v40 = vmul.f32 %v85_v38, %v45_v25 }
  0xa5   :  { %v88_v41 = vmul.f32 %v87_v40, %v65_v39 }
  0xa7   :  { %121 = vmatmul.f32.vlgmr.msra.gmra.mxu2 %v88_v41 }
 0x12a   :  { %v122_v42 = vpop.f32.mrf.mxu2 }
 0x12b   :  { %129 = vst.msk [vmem:[#allocation2] sm:$0xff] %vm24_vm0, %v122_v42 }
 0x132   :  { %v140_v43 = vld [vmem:[#allocation2] sm:$0xff] }
 0x133   :  { %141 = vst.msk [vmem:[#allocation3] sm:$0xff] %vm24_vm0, %v140_v43 }
 0x134   :  { %152 = dma.vmem_to_hbm [thread:$0]  %s148_s6, 128, %s150_s1, [#allocation4]  }
 0x135   :  { %190 = dma.done.wait [#allocation4], 128  }
 0x136   :  { %191 = vsyncadd [#allocation4], 4294967168 }
 0x137   :  { %157 = vsyncpa [#allocation4], 1 }

</bundles_post_ra>
